<compile_context>
chip_gen: v7x
topology: tpu7x:2x2x1
jax: 0.10.0
libtpu: 0.0.40
codegen_flags: <defaults>
</compile_context>

<pallas_src>
import functools

import jax
import jax.numpy as jnp
from jax.experimental import pallas as pl
from jax.experimental.pallas import tpu as pltpu


NEG_SLOPE = 0.2   # nn.LeakyReLU(0.2)
LANE = 128


def _leaky_relu(x):
    return jnp.where(x > 0, x, NEG_SLOPE * x)


def _round_up(n, m):
    return ((n + m - 1) // m) * m


def _pick_tile(B, tile_b_max):
    """Pick (tile_b, num_tiles) with tile_b a lane multiple and, when there is
    more than one grid step, an even step count (balances v7x's 2 TCs)."""
    b128 = _round_up(B, LANE)
    tile_b_max = max(LANE, _round_up(tile_b_max, LANE))
    if b128 <= tile_b_max:
        return b128, 1
    nt = pl.cdiv(b128, tile_b_max)
    if nt % 2 == 1:
        nt += 1
    tile = _round_up(pl.cdiv(b128, nt), LANE)
    return tile, nt


def icnn_kernel(
    xT_ref,      # (D, TILE_B)        x^T tile — batch on the lane axis (streamed)
    wcat_ref,    # (ROWS_P, D)        [W1; W2n; W3n; Wll; 0-pad] (resident)
    bcat_ref,    # (ROWS_P, 1)        [b1; b2; b3; bll; 0-pad], f32 (resident)
    w2c_ref,     # (HP, HP)           fc2_convex (resident)
    w3c_ref,     # (HP, HP)           fc3_convex (resident)
    wlc_ref,     # (HP, 1)            last_convex column, f32 (resident)
    out_ref,     # (1, 1, TILE_B)     lane-dense output slab
    *,
    hp,
    tile_b,
):
    xt = xT_ref[...]                                    # (D, TILE_B)
    op_dt = wcat_ref.dtype                              # f32 or bf16 (MXU operands)

    # Fused projection of x through fc1/fc2/fc3 "normal" + last_linear at once.
    xproj = (
        jnp.dot(wcat_ref[...], xt.astype(op_dt),
                preferred_element_type=jnp.float32)
        + bcat_ref[...]                                 # f32 bias add (broadcast on lanes)
    )                                                   # (ROWS_P, TILE_B)
    n1 = xproj[0 * hp:1 * hp, :]
    n2 = xproj[1 * hp:2 * hp, :]
    n3 = xproj[2 * hp:3 * hp, :]
    lin = xproj[3 * hp:3 * hp + 1, :]                   # last_linear(x) + bias, (1, TILE_B)

    # x = activ_1(fc1_normal(input)) ** 2
    h1 = _leaky_relu(n1) ** 2
    # x = activ_2(fc2_convex(x) + fc2_normal(input))
    h2 = _leaky_relu(
        jnp.dot(w2c_ref[...], h1.astype(op_dt),
                preferred_element_type=jnp.float32) + n2
    )
    # x = activ_3(fc3_convex(x) + fc3_normal(input))
    h3 = _leaky_relu(
        jnp.dot(w3c_ref[...], h2.astype(op_dt),
                preferred_element_type=jnp.float32) + n3
    )

    # last_convex: VPU multiply + cross-sublane (XLU) reduce instead of M=1 matmul.
    conv = jnp.sum(wlc_ref[...] * h3, axis=0, keepdims=True)        # (1, TILE_B)

    # out = last_convex(x) + last_linear(input) ** 2
    out_ref[...] = (conv + lin * lin).reshape(1, 1, tile_b)


def icnn_forward(x, packed, *, tile_b=2048):
    """x: (B, D) float32. packed: dict from pack_params(). Returns (B, 1) f32."""
    B, D = x.shape
    hp = packed["hp"]
    rows_p = packed["wcat"].shape[0]

    tile, num_tiles = _pick_tile(B, tile_b)
    b_pad = tile * num_tiles

    xT = x.T.astype(packed["wcat"].dtype)               # (D, B), batch on lanes
    if b_pad != B:
        xT = jnp.pad(xT, ((0, 0), (0, b_pad - B)))      # padded cols computed & sliced away

    const = lambda i: (0, 0)
    kernel = functools.partial(icnn_kernel, hp=hp, tile_b=tile)

    out = pl.pallas_call(
        kernel,
        out_shape=jax.ShapeDtypeStruct((num_tiles, 1, tile), jnp.float32),
        grid_spec=pltpu.PrefetchScalarGridSpec(
            num_scalar_prefetch=0,
            grid=(num_tiles,),
            in_specs=[
                pl.BlockSpec((D, tile), lambda i: (0, i)),    # x^T tile (streamed)
                pl.BlockSpec((rows_p, D), const),             # resident weights
                pl.BlockSpec((rows_p, 1), const),
                pl.BlockSpec((hp, hp), const),
                pl.BlockSpec((hp, hp), const),
                pl.BlockSpec((hp, 1), const),
            ],
            out_specs=pl.BlockSpec((1, 1, tile), lambda i: (i, 0, 0)),
        ),
        compiler_params=pltpu.CompilerParams(
            dimension_semantics=("parallel",),
        ),
    )(
        xT,
        packed["wcat"], packed["bcat"],
        packed["w2c"], packed["w3c"], packed["wlc"],
    )
    return out.reshape(b_pad)[:B].reshape(B, 1)


def init_params(key, input_dim, hidden_dim):
    """PyTorch-style params: weight (out_features, in_features), bias (out_features, 1).
    Init mimics nn.Linear default: U(-1/sqrt(fan_in), 1/sqrt(fan_in))."""
    def linear(key, fan_in, fan_out, bias=True):
        kw, kb = jax.random.split(key)
        bound = float(fan_in) ** -0.5
        w = jax.random.uniform(kw, (fan_out, fan_in), jnp.float32, -bound, bound)
        if bias:
            b = jax.random.uniform(kb, (fan_out, 1), jnp.float32, -bound, bound)
            return w, b
        return w, None

    keys = jax.random.split(key, 7)
    w1, b1 = linear(keys[0], input_dim, hidden_dim, bias=True)     # fc1_normal
    w2n, b2 = linear(keys[1], input_dim, hidden_dim, bias=True)    # fc2_normal
    w2c, _ = linear(keys[2], hidden_dim, hidden_dim, bias=False)   # fc2_convex
    w3n, b3 = linear(keys[3], input_dim, hidden_dim, bias=True)    # fc3_normal
    w3c, _ = linear(keys[4], hidden_dim, hidden_dim, bias=False)   # fc3_convex
    wlc, _ = linear(keys[5], hidden_dim, 1, bias=False)            # last_convex
    wll, bll = linear(keys[6], input_dim, 1, bias=True)            # last_linear
    return dict(
        w1=w1, b1=b1, w2n=w2n, b2=b2, w2c=w2c,
        w3n=w3n, b3=b3, w3c=w3c, wlc=wlc, wll=wll, bll=bll,
    )


def pack_params(p, input_dim, hidden_dim, use_bf16=False):
    """Pad hidden dim to a sublane multiple (8), fuse the x-projections + last_linear
    into one (ROWS_P, D) weight, and (optionally) cast MXU operands to bf16."""
    hp = _round_up(hidden_dim, 8)
    ph = hp - hidden_dim

    def pad_rows(w):                         # (H, *) -> (HP, *)
        return jnp.pad(w, ((0, ph), (0, 0)))

    rows = 3 * hp + 1
    rows_p = _round_up(rows, 8)

    wcat = jnp.concatenate(
        [pad_rows(p["w1"]), pad_rows(p["w2n"]), pad_rows(p["w3n"]), p["wll"]], axis=0
    )                                        # (3*HP + 1, D)
    wcat = jnp.pad(wcat, ((0, rows_p - rows), (0, 0)))               # (ROWS_P, D)
    bcat = jnp.concatenate(
        [pad_rows(p["b1"]), pad_rows(p["b2"]), pad_rows(p["b3"]), p["bll"]], axis=0
    )
    bcat = jnp.pad(bcat, ((0, rows_p - rows), (0, 0)))               # (ROWS_P, 1)

    def pad_sq(w):                           # (H, H) -> (HP, HP)
        return jnp.pad(w, ((0, ph), (0, ph)))

    op_dt = jnp.bfloat16 if use_bf16 else jnp.float32
    return dict(
        hp=hp,
        wcat=wcat.astype(op_dt),             # MXU operand (bf16 on v6e/v7x path)
        bcat=bcat,                           # f32: added after f32 accumulation
        w2c=pad_sq(p["w2c"]).astype(op_dt),
        w3c=pad_sq(p["w3c"]).astype(op_dt),
        wlc=pad_rows(p["wlc"].T),            # (HP, 1), f32: VPU multiply + reduce
    )


def reference_forward(x, p):
    """Pure-JAX reference with the same math (row-batch layout)."""
    h1 = _leaky_relu(x @ p["w1"].T + p["b1"].T) ** 2
    h2 = _leaky_relu(h1 @ p["w2c"].T + x @ p["w2n"].T + p["b2"].T)
    h3 = _leaky_relu(h2 @ p["w3c"].T + x @ p["w3n"].T + p["b3"].T)
    return h3 @ p["wlc"].T + (x @ p["wll"].T + p["bll"].T) ** 2


if __name__ == "__main__":
    # Keep the XLA reference matmuls in full f32 so the comparison is meaningful.
    jax.config.update("jax_default_matmul_precision", "highest")

    INPUT_DIM, HIDDEN_DIM = 16, 32

    key = jax.random.PRNGKey(0)
    k_p, k_x, k_x2 = jax.random.split(key, 3)
    params = init_params(k_p, INPUT_DIM, HIDDEN_DIM)
    packed = pack_params(params, INPUT_DIM, HIDDEN_DIM)

    # Small case (single grid step).
    B = 8
    x = jax.random.normal(k_x, (B, INPUT_DIM), jnp.float32)
    out = jax.block_until_ready(icnn_forward(x, packed))
    ref = reference_forward(x, params)
    assert out.shape == (B, 1)
    assert jnp.allclose(out, ref, atol=2e-3, rtol=2e-3)

    # Larger case exercising the batch grid (4 even grid steps after padding).
    B2 = 1050
    x2 = jax.random.normal(k_x2, (B2, INPUT_DIM), jnp.float32)
    out2 = jax.block_until_ready(icnn_forward(x2, packed, tile_b=512))
    ref2 = reference_forward(x2, params)
    assert out2.shape == (B2, 1)
    assert jnp.allclose(out2, ref2, atol=2e-3, rtol=2e-3)

    # bf16 MXU-operand path (v6e/v7x): f32 accumulation/activations, loose tolerance.
    packed_bf16 = pack_params(params, INPUT_DIM, HIDDEN_DIM, use_bf16=True)
    out3 = jax.block_until_ready(icnn_forward(x2, packed_bf16, tile_b=512))
    assert out3.shape == (B2, 1)
    assert jnp.allclose(out3, ref2, atol=1.5e-1, rtol=1.5e-1)

    print("KERNEL_OK")
</pallas_src>

<mosaic_0001>
module attributes {stable_mosaic.version = 11 : i64} {
  func.func @icnn_kernel(%arg0: i32, %arg1: memref<16x128xf32, #tpu.memory_space<vmem>>, %arg2: memref<104x16xf32, #tpu.memory_space<vmem>>, %arg3: memref<104x1xf32, #tpu.memory_space<vmem>>, %arg4: memref<32x32xf32, #tpu.memory_space<vmem>>, %arg5: memref<32x32xf32, #tpu.memory_space<vmem>>, %arg6: memref<32x1xf32, #tpu.memory_space<vmem>>, %arg7: memref<1x1x128xf32, #tpu.memory_space<vmem>>) attributes {dimension_semantics = [#tpu.dimension_semantics<parallel>], iteration_bounds = array<i64: 1>, scalar_prefetch = 0 : i64, scratch_operands = 0 : i64, tpu.core_type = #tpu.core_type<tc>, window_params = [{transform_indices = @transform_0, window_bounds = array<i64: 16, 128>}, {pipeline_mode = #tpu.pipeline_mode<synchronous>, transform_indices = @transform_1, window_bounds = array<i64: 104, 16>}, {pipeline_mode = #tpu.pipeline_mode<synchronous>, transform_indices = @transform_2, window_bounds = array<i64: 104, 1>}, {pipeline_mode = #tpu.pipeline_mode<synchronous>, transform_indices = @transform_3, window_bounds = array<i64: 32, 32>}, {pipeline_mode = #tpu.pipeline_mode<synchronous>, transform_indices = @transform_4, window_bounds = array<i64: 32, 32>}, {pipeline_mode = #tpu.pipeline_mode<synchronous>, transform_indices = @transform_5, window_bounds = array<i64: 32, 1>}, {transform_indices = @transform_6, window_bounds = array<i64: 1, 1, 128>}]} {
    %c0 = arith.constant 0 : index
    %c0_0 = arith.constant 0 : index
    %0 = vector.load %arg1[%c0, %c0_0] : memref<16x128xf32, #tpu.memory_space<vmem>>, vector<16x128xf32>
    %c0_1 = arith.constant 0 : index
    %c0_2 = arith.constant 0 : index
    %1 = vector.load %arg2[%c0_1, %c0_2] : memref<104x16xf32, #tpu.memory_space<vmem>>, vector<104x16xf32>
    %cst = arith.constant dense<0.000000e+00> : vector<104x128xf32>
    %2 = tpu.matmul %1, %0, %cst {dimension_numbers = #tpu.dot_dimension_numbers<[1], [0], [0], [1], [0, 0, 1, 1], [], []>, precision = #tpu.contract_precision<fp32>} : vector<104x16xf32>, vector<16x128xf32>, vector<104x128xf32> -> vector<104x128xf32>
    %c0_3 = arith.constant 0 : index
    %c0_4 = arith.constant 0 : index
    %3 = vector.load %arg3[%c0_3, %c0_4] : memref<104x1xf32, #tpu.memory_space<vmem>>, vector<104x1xf32>
    %4 = vector.broadcast %3 : vector<104x1xf32> to vector<104x128xf32>
    %5 = arith.addf %2, %4 : vector<104x128xf32>
    %6 = vector.extract_strided_slice %5 {offsets = [0, 0], sizes = [32, 128], strides = [1, 1]} : vector<104x128xf32> to vector<32x128xf32>
    %7 = vector.extract_strided_slice %5 {offsets = [32, 0], sizes = [32, 128], strides = [1, 1]} : vector<104x128xf32> to vector<32x128xf32>
    %8 = vector.extract_strided_slice %5 {offsets = [64, 0], sizes = [32, 128], strides = [1, 1]} : vector<104x128xf32> to vector<32x128xf32>
    %9 = vector.extract_strided_slice %5 {offsets = [96, 0], sizes = [1, 128], strides = [1, 1]} : vector<104x128xf32> to vector<1x128xf32>
    %cst_5 = arith.constant 0.000000e+00 : f32
    %10 = vector.broadcast %cst_5 : f32 to vector<32x128xf32>
    %11 = arith.cmpf ogt, %6, %10 : vector<32x128xf32>
    %cst_6 = arith.constant 2.000000e-01 : f32
    %12 = vector.broadcast %cst_6 : f32 to vector<32x128xf32>
    %13 = arith.mulf %12, %6 : vector<32x128xf32>
    %14 = arith.select %11, %6, %13 : vector<32x128xi1>, vector<32x128xf32>
    %15 = arith.mulf %14, %14 : vector<32x128xf32>
    %c0_7 = arith.constant 0 : index
    %c0_8 = arith.constant 0 : index
    %16 = vector.load %arg4[%c0_7, %c0_8] : memref<32x32xf32, #tpu.memory_space<vmem>>, vector<32x32xf32>
    %cst_9 = arith.constant dense<0.000000e+00> : vector<32x128xf32>
    %17 = tpu.matmul %16, %15, %cst_9 {dimension_numbers = #tpu.dot_dimension_numbers<[1], [0], [0], [1], [0, 0, 1, 1], [], []>, precision = #tpu.contract_precision<fp32>} : vector<32x32xf32>, vector<32x128xf32>, vector<32x128xf32> -> vector<32x128xf32>
    %18 = arith.addf %17, %7 : vector<32x128xf32>
    %cst_10 = arith.constant 0.000000e+00 : f32
    %19 = vector.broadcast %cst_10 : f32 to vector<32x128xf32>
    %20 = arith.cmpf ogt, %18, %19 : vector<32x128xf32>
    %cst_11 = arith.constant 2.000000e-01 : f32
    %21 = vector.broadcast %cst_11 : f32 to vector<32x128xf32>
    %22 = arith.mulf %21, %18 : vector<32x128xf32>
    %23 = arith.select %20, %18, %22 : vector<32x128xi1>, vector<32x128xf32>
    %c0_12 = arith.constant 0 : index
    %c0_13 = arith.constant 0 : index
    %24 = vector.load %arg5[%c0_12, %c0_13] : memref<32x32xf32, #tpu.memory_space<vmem>>, vector<32x32xf32>
    %cst_14 = arith.constant dense<0.000000e+00> : vector<32x128xf32>
    %25 = tpu.matmul %24, %23, %cst_14 {dimension_numbers = #tpu.dot_dimension_numbers<[1], [0], [0], [1], [0, 0, 1, 1], [], []>, precision = #tpu.contract_precision<fp32>} : vector<32x32xf32>, vector<32x128xf32>, vector<32x128xf32> -> vector<32x128xf32>
    %26 = arith.addf %25, %8 : vector<32x128xf32>
    %cst_15 = arith.constant 0.000000e+00 : f32
    %27 = vector.broadcast %cst_15 : f32 to vector<32x128xf32>
    %28 = arith.cmpf ogt, %26, %27 : vector<32x128xf32>
    %cst_16 = arith.constant 2.000000e-01 : f32
    %29 = vector.broadcast %cst_16 : f32 to vector<32x128xf32>
    %30 = arith.mulf %29, %26 : vector<32x128xf32>
    %31 = arith.select %28, %26, %30 : vector<32x128xi1>, vector<32x128xf32>
    %c0_17 = arith.constant 0 : index
    %c0_18 = arith.constant 0 : index
    %32 = vector.load %arg6[%c0_17, %c0_18] : memref<32x1xf32, #tpu.memory_space<vmem>>, vector<32x1xf32>
    %33 = vector.broadcast %32 : vector<32x1xf32> to vector<32x128xf32>
    %34 = arith.mulf %33, %31 : vector<32x128xf32>
    %cst_19 = arith.constant dense<0.000000e+00> : vector<128xf32>
    %35 = vector.multi_reduction <add>, %34, %cst_19 [0] : vector<32x128xf32> to vector<128xf32>
    %36 = vector.shape_cast %35 : vector<128xf32> to vector<1x128xf32>
    %37 = arith.mulf %9, %9 : vector<1x128xf32>
    %38 = arith.addf %36, %37 : vector<1x128xf32>
    %39 = vector.shape_cast %38 : vector<1x128xf32> to vector<1x1x128xf32>
    %c0_20 = arith.constant 0 : index
    %c0_21 = arith.constant 0 : index
    %c0_22 = arith.constant 0 : index
    %40 = vector.load %arg7[%c0_20, %c0_21, %c0_22] : memref<1x1x128xf32, #tpu.memory_space<vmem>>, vector<1x1x128xf32>
    tpu.vector_store %arg7[%c0_20, %c0_21, %c0_22], %39 {strides = array<i32>} : memref<1x1x128xf32, #tpu.memory_space<vmem>>, vector<1x1x128xf32>,
    return
  }
  func.func @transform_0(%arg0: i32) -> (i32, i32) {
    %c0_i32 = arith.constant 0 : i32
    %c0_i32_0 = arith.constant 0 : i32
    return %c0_i32, %arg0 : i32, i32
  }
  func.func @transform_1(%arg0: i32) -> (i32, i32) {
    %c0_i32 = arith.constant 0 : i32
    %c0_i32_0 = arith.constant 0 : i32
    %c0_i32_1 = arith.constant 0 : i32
    return %c0_i32, %c0_i32_0 : i32, i32
  }
  func.func @transform_2(%arg0: i32) -> (i32, i32) {
    %c0_i32 = arith.constant 0 : i32
    %c0_i32_0 = arith.constant 0 : i32
    %c0_i32_1 = arith.constant 0 : i32
    return %c0_i32, %c0_i32_0 : i32, i32
  }
  func.func @transform_3(%arg0: i32) -> (i32, i32) {
    %c0_i32 = arith.constant 0 : i32
    %c0_i32_0 = arith.constant 0 : i32
    %c0_i32_1 = arith.constant 0 : i32
    return %c0_i32, %c0_i32_0 : i32, i32
  }
  func.func @transform_4(%arg0: i32) -> (i32, i32) {
    %c0_i32 = arith.constant 0 : i32
    %c0_i32_0 = arith.constant 0 : i32
    %c0_i32_1 = arith.constant 0 : i32
    return %c0_i32, %c0_i32_0 : i32, i32
  }
  func.func @transform_5(%arg0: i32) -> (i32, i32) {
    %c0_i32 = arith.constant 0 : i32
    %c0_i32_0 = arith.constant 0 : i32
    %c0_i32_1 = arith.constant 0 : i32
    return %c0_i32, %c0_i32_0 : i32, i32
  }
  func.func @transform_6(%arg0: i32) -> (i32, i32, i32) {
    %c0_i32 = arith.constant 0 : i32
    %c0_i32_0 = arith.constant 0 : i32
    %c0_i32_1 = arith.constant 0 : i32
    return %arg0, %c0_i32, %c0_i32_0 : i32, i32, i32
  }
}

</mosaic_0001>

<bundles_post_ra>
// kernel: tpu_custom_call.1
= control target key start
LH: loop header
LB: loop body
LE: loop exit
PB: predicated region body
PF: predicated region fallthrough
CT: control target
= control target key end

     0   :  { %v3374_v3 = vmov 0.0|0.0   ;;  %vm3375_vm0 = vmmov 0   ;;  %v3376_v6 = vmov 0.0   ;;  %vm117_vm1 = vcmask 130048   ;;  %s4156_s0 = inlined_call_operand.vmem [shape: f32[16,128], index: 0, kind: input, shape index: {}]   ;;  %s4157_s1 = inlined_call_operand.vmem [shape: f32[104,16], index: 1, kind: input, shape index: {}]   ;;  %s4158_s2 = inlined_call_operand.vmem [shape: f32[104,1], index: 2, kind: input, shape index: {}]   ;;  %s4159_s3 = inlined_call_operand.vmem [shape: f32[32,32], index: 3, kind: input, shape index: {}]   ;;  %s4160_s4 = inlined_call_operand.vmem [shape: f32[32,32], index: 4, kind: input, shape index: {}]   ;;  %s4161_s5 = inlined_call_operand.vmem [shape: f32[32,1], index: 5, kind: input, shape index: {}]   ;;  %s4162_s6 = inlined_call_operand.hbm [shape: f32[1,1,128], index: 6, kind: output, shape index: {}]  }
   0x1   :  { %v24_v0 = vld [vmem:[%s4156_s0] sm:$0xff]  ;;  %v25_v1 = vld [vmem:[%s4156_s0 + $0x8] sm:$0xff]  ;;  %3105 = vmatprep.subr.bf16.mxu0 %v3374_v3  ;;  %2763 = vmatprep.mubr.msk.f32.mxu0 %vm3375_vm0, %v3376_v6  ;;  %v28_v8 = vld [vmem:[%s4157_s1 + $0x10] sm:$0xff] }
   0x2   :  { %v26_v2 = vld [vmem:[%s4157_s1] sm:$0xff]  ;;  %v158_v4 = vand.u32 4294901760, %v24_v0  ;;  %v161_v5 = vand.u32 4294901760, %v25_v1  ;;  %v27_v7 = vld [vmem:[%s4157_s1 + $0x8] sm:$0xff]  ;;  %3099 = vmatprep.subr.bf16.mxu1 %v3374_v3  ;;  %2677 = vmatprep.mubr.msk.f32.mxu1 %vm3375_vm0, %v3376_v6  ;;  %v125_v14 = vsel %vm117_vm1, %v28_v8, 0  ;;  %v29_v16 = vld [vmem:[%s4157_s1 + $0x18] sm:$0xff] }
   0x3   :  { %v119_v9 = vsel %vm117_vm1, %v26_v2, 0  ;;  %v122_v13 = vsel %vm117_vm1, %v27_v7, 0 }
   0x4   :  { %v3436_v10 = vsub.f32 %v24_v0, %v158_v4  ;;  %v3438_v11 = vsub.f32 %v25_v1, %v161_v5  ;;  %v3440_v12 = vand.u32 4294901760, %v119_v9 }
   0x6   :  { %v3106_v15 = vpack.c.bf16 %v3438_v11, %v3436_v10 }
   0x7   :  { %11 = vsyncpa [#allocation3], 0  ;;  %v3450_v17 = vsub.f32 %v119_v9, %v3440_v12  ;;  %v3452_v18 = vand.u32 4294901760, %v122_v13  ;;  %v3454_v19 = vand.u32 4294901760, %v125_v14  ;;  %v128_v20 = vsel %vm117_vm1, %v29_v16, 0  ;;  %v30_v21 = vld [vmem:[%s4157_s1 + $0x20] sm:$0xff] }
   0x8   :  { %3107 = vmatpush3.bf16.msra.mxu0 %v3106_v15  ;;  %v3461_v22 = vpack.c.bf16 %v161_v5, %v158_v4  ;;  %v3472_v25 = vand.u32 4294901760, %v128_v20  ;;  %v131_v27 = vsel %vm117_vm1, %v30_v21, 0  ;;  %v31_v29 = vld [vmem:[%s4157_s1 + $0x28] sm:$0xff]  ;;  %v32_v37 = vld [vmem:[%s4157_s1 + $0x30] sm:$0xff]  ;;  %v357_v43 = vand.u32 4294901760, %v3436_v10  ;;  %v33_v46 = vld [vmem:[%s4157_s1 + $0x38] sm:$0xff] }
   0x9   :  { %3108 = vmatprep.subr.bf16.mxu0 %v3374_v3  ;;  %v3465_v23 = vsub.f32 %v122_v13, %v3452_v18  ;;  %v3470_v24 = vsub.f32 %v125_v14, %v3454_v19  ;;  %v226_v26 = vand.u32 4294901760, %v3450_v17  ;;  %v3497_v34 = vand.u32 4294901760, %v131_v27  ;;  %v34_v57 = vld [vmem:[%s4157_s1 + $0x40] sm:$0xff]  ;;  %v35_v1 = vld [vmem:[%s4157_s1 + $0x48] sm:$0xff]  ;;  %v36_v13 = vld [vmem:[%s4157_s1 + $0x50] sm:$0xff] }
   0xa   :  { %3101 = vmatpush3.bf16.msra.mxu1 %v3461_v22  ;;  %v3495_v33 = vsub.f32 %v128_v20, %v3472_v25  ;;  %v134_v36 = vsel %vm117_vm1, %v31_v29, 0  ;;  %v137_v44 = vsel %vm117_vm1, %v32_v37, 0  ;;  %v364_v45 = vand.u32 4294901760, %v3438_v11  ;;  %v37_v29 = vld [vmem:[%s4157_s1 + $0x58] sm:$0xff] }
   0xb   :  { %2764 = vmatmul.mubr.f32.vlgmr.msra.gmra.mrb[0].mxu0 %v3450_v17  ;;  %v236_v28 = vand.u32 4294901760, %v3465_v23  ;;  %v227_v30 = vsub.f32 %v3450_v17, %v226_v26  ;;  %v246_v31 = vand.u32 4294901760, %v3470_v24  ;;  %3102 = vmatprep.subr.bf16.mxu1 %v3374_v3  ;;  %v3513_v41 = vsub.f32 %v131_v27, %v3497_v34  ;;  %v41_v17 = vld [vmem:[%s4158_s2 + $0x10] sm:$0xff] }
   0xc   :  { %2766 = vmatprep.mubr.msk.f32.mxu0 %vm3375_vm0, %v3376_v6  ;;  %3110 = vmatpush3.bf16.msra.mxu0 %v3461_v22  ;;  %v256_v40 = vand.u32 4294901760, %v3495_v33  ;;  %v3515_v42 = vand.u32 4294901760, %v134_v36  ;;  %v358_v50 = vsub.f32 %v3436_v10, %v357_v43  ;;  %v365_v51 = vsub.f32 %v3438_v11, %v364_v45  ;;  %v39_v10 = vld [vmem:[%s4158_s2] sm:$0xff] }
   0xd   :  { %3111 = vmatprep.subr.bf16.mxu0 %v3374_v3  ;;  %v237_v32 = vsub.f32 %v3465_v23, %v236_v28  ;;  %v228_v35 = vand.u32 4294901760, %v227_v30  ;;  %v247_v39 = vsub.f32 %v3470_v24, %v246_v31  ;;  %v266_v49 = vand.u32 4294901760, %v3513_v41 }
   0xe   :  { %v257_v48 = vsub.f32 %v3495_v33, %v256_v40  ;;  %v3539_v52 = vsub.f32 %v134_v36, %v3515_v42  ;;  %v3541_v53 = vand.u32 4294901760, %v137_v44  ;;  %v359_v54 = vand.u32 4294901760, %v358_v50 }
   0xf   :  { %2767 = vmatmul.mubr.f32.gmra.mrb[2].mxu0 %v3465_v23  ;;  %2678 = vmatmul.mubr.f32.vlgmr.msra.gmra.mrb[0].mxu1 %v228_v35  ;;  %v238_v38 = vand.u32 4294901760, %v237_v32  ;;  %v248_v47 = vand.u32 4294901760, %v247_v39  ;;  %v140_v55 = vsel %vm117_vm1, %v33_v46, 0  ;;  %v366_v56 = vand.u32 4294901760, %v365_v51  ;;  %v38_v39 = vld [vmem:[%s4157_s1 + $0x60] sm:$0xff]  ;;  %v42_v23 = vld [vmem:[%s4158_s2 + $0x18] sm:$0xff] }
  0x10   :  { %2769 = vmatprep.mubr.msk.f32.mxu0 %vm3375_vm0, %v3376_v6  ;;  %2680 = vmatprep.mubr.msk.f32.mxu1 %vm3375_vm0, %v3376_v6  ;;  %v258_v58 = vand.u32 4294901760, %v257_v48  ;;  %v267_v59 = vsub.f32 %v3513_v41, %v266_v49  ;;  %v276_v60 = vand.u32 4294901760, %v3539_v52  ;;  %v3557_v62 = vsub.f32 %v137_v44, %v3541_v53 }
  0x11   :  { %v3103_v61 = vpack.c.bf16 %v366_v56, %v359_v54  ;;  %v3559_v63 = vand.u32 4294901760, %v140_v55  ;;  %v143_v0 = vsel %vm117_vm1, %v34_v57, 0  ;;  %v146_v9 = vsel %vm117_vm1, %v35_v1, 0 }
  0x12   :  { %v268_v2 = vand.u32 4294901760, %v267_v59  ;;  %v277_v4 = vsub.f32 %v3539_v52, %v276_v60  ;;  %v286_v5 = vand.u32 4294901760, %v3557_v62  ;;  %v3577_v8 = vand.u32 4294901760, %v143_v0 }
  0x13   :  { %2770 = vmatmul.mubr.f32.gmra.mrb[4].mxu0 %v3470_v24  ;;  %2681 = vmatmul.mubr.f32.gmra.mrb[2].mxu1 %v238_v38  ;;  %v3575_v7 = vsub.f32 %v140_v55, %v3559_v63  ;;  %v3595_v21 = vand.u32 4294901760, %v146_v9  ;;  %v149_v27 = vsel %vm117_vm1, %v36_v13, 0  ;;  %v152_v38 = vsel %vm117_vm1, %v37_v29, 0  ;;  %v43_v24 = vld [vmem:[%s4158_s2 + $0x20] sm:$0xff] }
  0x14   :  { %2772 = vmatprep.mubr.msk.f32.mxu0 %vm3375_vm0, %v3376_v6  ;;  %2683 = vmatprep.mubr.msk.f32.mxu1 %vm3375_vm0, %v3376_v6  ;;  %v278_v14 = vand.u32 4294901760, %v277_v4  ;;  %v287_v15 = vsub.f32 %v3557_v62, %v286_v5  ;;  %v3593_v20 = vsub.f32 %v143_v0, %v3577_v8  ;;  %v3613_v37 = vand.u32 4294901760, %v149_v27 }
  0x15   :  { %3104 = vmatpush3.bf16.msra.mxu1 %v3103_v61  ;;  %v296_v16 = vand.u32 4294901760, %v3575_v7  ;;  %v3611_v36 = vsub.f32 %v146_v9, %v3595_v21  ;;  %v3631_v50 = vand.u32 4294901760, %v152_v38  ;;  %v155_v51 = vsel %vm117_vm1, %v38_v39, 0 }
  0x16   :  { %v288_v30 = vand.u32 4294901760, %v287_v15  ;;  %v306_v35 = vand.u32 4294901760, %v3593_v20  ;;  %v3629_v48 = vsub.f32 %v149_v27, %v3613_v37  ;;  %v3112_v15 = vpack.c.bf16 %v364_v45, %v357_v43  ;;  %v50_v43 = vld [vmem:[%s4158_s2 + $0x58] sm:$0xff]  ;;  %v2433_v45 = vld [vmem:[%s4161_s5] sm:$0xff] }
  0x17   :  { %2773 = vmatmul.mubr.f32.gmra.mrb[6].mxu0 %v3495_v33  ;;  %2684 = vmatmul.mubr.f32.gmra.mrb[4].mxu1 %v248_v47  ;;  %v297_v32 = vsub.f32 %v3575_v7, %v296_v16  ;;  %v316_v47 = vand.u32 4294901760, %v3611_v36  ;;  %v3644_v57 = vsub.f32 %v152_v38, %v3631_v50  ;;  %v3377_v11 = vmov 0   ;;  %v47_v33 = vld [vmem:[%s4158_s2 + $0x40] sm:$0xff] }
  0x18   :  { %2775 = vmatprep.mubr.msk.f32.mxu0 %vm3375_vm0, %v3376_v6  ;;  %2686 = vmatprep.mubr.msk.f32.mxu1 %vm3375_vm0, %v3376_v6  ;;  %v307_v46 = vsub.f32 %v3593_v20, %v306_v35  ;;  %v326_v56 = vand.u32 4294901760, %v3629_v48  ;;  %vm1152_vm2 = vcmask 261120  }
  0x19   :  { %v298_v44 = vand.u32 4294901760, %v297_v32  ;;  %v317_v55 = vsub.f32 %v3611_v36, %v316_v47  ;;  %v336_v0 = vand.u32 4294901760, %v3644_v57  ;;  %3348 = vset.pattern.permute.xlu0 %v3377_v11  ;;  %3349 = vset.pattern.permute.xlu1 %v3377_v11 }
  0x1a   :  { %v308_v54 = vand.u32 4294901760, %v307_v46  ;;  %v327_v61 = vsub.f32 %v3629_v48, %v326_v56  ;;  %54 = vperm.xlu0 %3348, %v39_v10   ;;  %64 = vperm.xlu1 %3349, %v41_v17   ;;  %v1151_v17 = vld [vmem:[%s4159_s3 + $0x18] sm:$0xff] }
  0x1b   :  { %2776 = vmatmul.mubr.f32.gmra.mrb[8].mxu0 %v3513_v41  ;;  %2687 = vmatmul.mubr.f32.gmra.mrb[6].mxu1 %v258_v58  ;;  %v3646_v58 = vand.u32 4294901760, %v155_v51  ;;  %v318_v59 = vand.u32 4294901760, %v317_v55  ;;  %v337_v4 = vsub.f32 %v3644_v57, %v336_v0  ;;  %v49_v41 = vld [vmem:[%s4158_s2 + $0x50] sm:$0xff] }
  0x1c   :  { %2778 = vmatprep.mubr.msk.f32.mxu0 %vm3375_vm0, %v3376_v6  ;;  %2689 = vmatprep.mubr.msk.f32.mxu1 %vm3375_vm0, %v3376_v6 }
  0x1d   :  { %v3658_v1 = vsub.f32 %v155_v51, %v3646_v58  ;;  %v338_v13 = vand.u32 4294901760, %v337_v4 }
  0x1e   :  { %69 = vperm.xlu1 %3349, %v42_v23  }
  0x1f   :  { %2779 = vmatmul.mubr.f32.gmra.mrb[10].mxu0 %v3539_v52  ;;  %2690 = vmatmul.mubr.f32.gmra.mrb[8].mxu1 %v268_v2  ;;  %v328_v2 = vand.u32 4294901760, %v327_v61  ;;  %v346_v9 = vand.u32 4294901760, %v3658_v1  ;;  %v2435_v52 = vld [vmem:[%s4161_s5 + $0x10] sm:$0xff] }
  0x20   :  { %2781 = vmatprep.mubr.msk.f32.mxu0 %vm3375_vm0, %v3376_v6  ;;  %2692 = vmatprep.mubr.msk.f32.mxu1 %vm3375_vm0, %v3376_v6 }
  0x23   :  { %2782 = vmatmul.mubr.f32.gmra.mrb[12].mxu0 %v3557_v62  ;;  %2693 = vmatmul.mubr.f32.gmra.mrb[10].mxu1 %v278_v14  ;;  %v347_v14 = vsub.f32 %v3658_v1, %v346_v9  ;;  %v51_v62 = vld [vmem:[%s4158_s2 + $0x60] sm:$0xff] }
  0x24   :  { %2784 = vmatprep.mubr.msk.f32.mxu0 %vm3375_vm0, %v3376_v6  ;;  %2695 = vmatprep.mubr.msk.f32.mxu1 %vm3375_vm0, %v3376_v6 }
  0x25   :  { %v348_v27 = vand.u32 4294901760, %v347_v14 }
  0x27   :  { %2785 = vmatmul.mubr.f32.gmra.mrb[14].mxu0 %v3575_v7  ;;  %2696 = vmatmul.mubr.f32.gmra.mrb[12].mxu1 %v288_v30 }
  0x28   :  { %2787 = vmatprep.mubr.msk.f32.mxu0 %vm3375_vm0, %v3376_v6  ;;  %2698 = vmatprep.mubr.msk.f32.mxu1 %vm3375_vm0, %v3376_v6 }
  0x2b   :  { %2788 = vmatmul.mubr.f32.gmra.mrb[16].mxu0 %v3593_v20  ;;  %2699 = vmatmul.mubr.f32.gmra.mrb[14].mxu1 %v298_v44 }
  0x2c   :  { %2790 = vmatprep.mubr.msk.f32.mxu0 %vm3375_vm0, %v3376_v6  ;;  %2701 = vmatprep.mubr.msk.f32.mxu1 %vm3375_vm0, %v3376_v6 }
  0x2f   :  { %2791 = vmatmul.mubr.f32.gmra.mrb[18].mxu0 %v3611_v36  ;;  %2702 = vmatmul.mubr.f32.gmra.mrb[16].mxu1 %v308_v54 }
  0x30   :  { %2793 = vmatprep.mubr.msk.f32.mxu0 %vm3375_vm0, %v3376_v6  ;;  %2704 = vmatprep.mubr.msk.f32.mxu1 %vm3375_vm0, %v3376_v6 }
  0x33   :  { %2794 = vmatmul.mubr.f32.gmra.mrb[20].mxu0 %v3629_v48  ;;  %2705 = vmatmul.mubr.f32.gmra.mrb[18].mxu1 %v318_v59 }
  0x34   :  { %2796 = vmatprep.mubr.msk.f32.mxu0 %vm3375_vm0, %v3376_v6  ;;  %2707 = vmatprep.mubr.msk.f32.mxu1 %vm3375_vm0, %v3376_v6 }
  0x37   :  { %2797 = vmatmul.mubr.f32.gmra.mrb[22].mxu0 %v3644_v57  ;;  %2708 = vmatmul.mubr.f32.gmra.mrb[20].mxu1 %v328_v2 }
  0x38   :  { %2799 = vmatprep.mubr.msk.f32.mxu0 %vm3375_vm0, %v3376_v6  ;;  %2710 = vmatprep.mubr.msk.f32.mxu1 %vm3375_vm0, %v3376_v6 }
  0x3b   :  { %2800 = vmatmul.mubr.f32.gmra.mrb[24].mxu0 %v3658_v1  ;;  %2711 = vmatmul.mubr.f32.gmra.mrb[22].mxu1 %v338_v13 }
  0x3c   :  { %2806 = vmatprep.mubr.msk.f32.mxu0 %vm3375_vm0, %v3376_v6  ;;  %2713 = vmatprep.mubr.msk.f32.mxu1 %vm3375_vm0, %v3376_v6 }
  0x3f   :  { %2807 = vmatmul.mubr.f32.vlgmr.msra.gmra.mrb[0].mxu0 %v226_v26  ;;  %2714 = vmatmul.mubr.f32.gmra.mrb[24].mxu1 %v348_v27  ;;  %v44_v26 = vld [vmem:[%s4158_s2 + $0x28] sm:$0xff] }
  0x40   :  { %2809 = vmatprep.mubr.msk.f32.mxu0 %vm3375_vm0, %v3376_v6  ;;  %3113 = vmatpush3.bf16.msra.mxu0 %v3112_v15  ;;  %v1150_v15 = vld [vmem:[%s4159_s3 + $0x10] sm:$0xff] }
  0x41   :  { %3114 = vmatprep.subr.bf16.mxu0 %v3374_v3  ;;  %2720 = vmatprep.mubr.msk.f32.mxu1 %vm3375_vm0, %v3376_v6  ;;  %v40_v3 = vld [vmem:[%s4158_s2 + $0x8] sm:$0xff] }
  0x42   :  { %59 = vperm.xlu0 %3348, %v40_v3   ;;  %79 = vperm.xlu1 %3349, %v44_v26   ;;  %v1160_v26 = vsel %vm1152_vm2, %v1150_v15, 0 }
  0x43   :  { %2810 = vmatmul.mubr.f32.gmra.mrb[2].mxu0 %v236_v28  ;;  %2721 = vmatmul.mubr.f32.vlgmr.msra.gmra.mrb[0].mxu1 %v3440_v12  ;;  %v45_v28 = vld [vmem:[%s4158_s2 + $0x30] sm:$0xff] }
  0x44   :  { %2812 = vmatprep.mubr.msk.f32.mxu0 %vm3375_vm0, %v3376_v6  ;;  %2723 = vmatprep.mubr.msk.f32.mxu1 %vm3375_vm0, %v3376_v6 }
  0x46   :  { %74 = vperm.xlu0 %3348, %v43_v24  }
  0x47   :  { %2813 = vmatmul.mubr.f32.gmra.mrb[4].mxu0 %v246_v31  ;;  %2724 = vmatmul.mubr.f32.gmra.mrb[2].mxu1 %v3452_v18  ;;  %v46_v31 = vld [vmem:[%s4158_s2 + $0x38] sm:$0xff] }
  0x48   :  { %2815 = vmatprep.mubr.msk.f32.mxu0 %vm3375_vm0, %v3376_v6  ;;  %2726 = vmatprep.mubr.msk.f32.mxu1 %vm3375_vm0, %v3376_v6 }
  0x49   :  { %89 = vperm.xlu1 %3349, %v46_v31  }
  0x4a   :  { %84 = vperm.xlu0 %3348, %v45_v28  }
  0x4b   :  { %2816 = vmatmul.mubr.f32.gmra.mrb[6].mxu0 %v256_v40  ;;  %2727 = vmatmul.mubr.f32.gmra.mrb[4].mxu1 %v3454_v19  ;;  %v48_v40 = vld [vmem:[%s4158_s2 + $0x48] sm:$0xff] }
  0x4c   :  { %2818 = vmatprep.mubr.msk.f32.mxu0 %vm3375_vm0, %v3376_v6  ;;  %2729 = vmatprep.mubr.msk.f32.mxu1 %vm3375_vm0, %v3376_v6 }
  0x4d   :  { %99 = vperm.xlu1 %3349, %v48_v40  }
  0x4e   :  { %94 = vperm.xlu0 %3348, %v47_v33  }
  0x4f   :  { %2819 = vmatmul.mubr.f32.gmra.mrb[8].mxu0 %v266_v49  ;;  %2730 = vmatmul.mubr.f32.gmra.mrb[6].mxu1 %v3472_v25  ;;  %v2434_v49 = vld [vmem:[%s4161_s5 + $0x8] sm:$0xff] }
  0x50   :  { %2821 = vmatprep.mubr.msk.f32.mxu0 %vm3375_vm0, %v3376_v6  ;;  %2732 = vmatprep.mubr.msk.f32.mxu1 %vm3375_vm0, %v3376_v6 }
  0x51   :  { %109 = vperm.xlu1 %3349, %v50_v43   ;;  %v1163_v43 = vsel %vm1152_vm2, %v1151_v17, 0 }
  0x52   :  { %104 = vperm.xlu0 %3348, %v49_v41  }
  0x53   :  { %2822 = vmatmul.mubr.f32.gmra.mrb[10].mxu0 %v276_v60  ;;  %2733 = vmatmul.mubr.f32.gmra.mrb[8].mxu1 %v3497_v34  ;;  %v2436_v60 = vld [vmem:[%s4161_s5 + $0x18] sm:$0xff] }
  0x54   :  { %2824 = vmatprep.mubr.msk.f32.mxu0 %vm3375_vm0, %v3376_v6  ;;  %2735 = vmatprep.mubr.msk.f32.mxu1 %vm3375_vm0, %v3376_v6 }
  0x55   :  { %2444 = vperm.xlu1 %3349, %v2434_v49  }
  0x56   :  { %2439 = vperm.xlu0 %3348, %v2433_v45  }
  0x57   :  { %2825 = vmatmul.mubr.f32.gmra.mrb[12].mxu0 %v286_v5  ;;  %2736 = vmatmul.mubr.f32.gmra.mrb[10].mxu1 %v3515_v42 }
  0x58   :  { %2827 = vmatprep.mubr.msk.f32.mxu0 %vm3375_vm0, %v3376_v6  ;;  %2738 = vmatprep.mubr.msk.f32.mxu1 %vm3375_vm0, %v3376_v6 }
  0x59   :  { %2454 = vperm.xlu1 %3349, %v2436_v60   ;;  %v3948_v60 = vand.u32 4294901760, %v1160_v26 }
  0x5a   :  { %2449 = vperm.xlu0 %3348, %v2435_v52  }
  0x5b   :  { %2828 = vmatmul.mubr.f32.gmra.mrb[14].mxu0 %v296_v16  ;;  %2739 = vmatmul.mubr.f32.gmra.mrb[12].mxu1 %v3541_v53 }
  0x5c   :  { %2830 = vmatprep.mubr.msk.f32.mxu0 %vm3375_vm0, %v3376_v6  ;;  %2741 = vmatprep.mubr.msk.f32.mxu1 %vm3375_vm0, %v3376_v6 }
  0x5e   :  { %114 = vperm.xlu0 %3348, %v51_v62  }
  0x5f   :  { %2831 = vmatmul.mubr.f32.gmra.mrb[16].mxu0 %v306_v35  ;;  %2742 = vmatmul.mubr.f32.gmra.mrb[14].mxu1 %v3559_v63 }
  0x60   :  { %2833 = vmatprep.mubr.msk.f32.mxu0 %vm3375_vm0, %v3376_v6  ;;  %2744 = vmatprep.mubr.msk.f32.mxu1 %vm3375_vm0, %v3376_v6 }
  0x63   :  { %2834 = vmatmul.mubr.f32.gmra.mrb[18].mxu0 %v316_v47  ;;  %2745 = vmatmul.mubr.f32.gmra.mrb[16].mxu1 %v3577_v8 }
  0x64   :  { %2836 = vmatprep.mubr.msk.f32.mxu0 %vm3375_vm0, %v3376_v6  ;;  %2747 = vmatprep.mubr.msk.f32.mxu1 %vm3375_vm0, %v3376_v6 }
  0x67   :  { %2837 = vmatmul.mubr.f32.gmra.mrb[20].mxu0 %v326_v56  ;;  %2748 = vmatmul.mubr.f32.gmra.mrb[18].mxu1 %v3595_v21 }
  0x68   :  { %2839 = vmatprep.mubr.msk.f32.mxu0 %vm3375_vm0, %v3376_v6  ;;  %2750 = vmatprep.mubr.msk.f32.mxu1 %vm3375_vm0, %v3376_v6 }
  0x6b   :  { %2840 = vmatmul.mubr.f32.gmra.mrb[22].mxu0 %v336_v0  ;;  %2751 = vmatmul.mubr.f32.gmra.mrb[20].mxu1 %v3613_v37  ;;  %v1149_v0 = vld [vmem:[%s4159_s3 + $0x8] sm:$0xff] }
  0x6c   :  { %2842 = vmatprep.mubr.msk.f32.mxu0 %vm3375_vm0, %v3376_v6  ;;  %2753 = vmatprep.mubr.msk.f32.mxu1 %vm3375_vm0, %v3376_v6  ;;  %v1157_v14 = vsel %vm1152_vm2, %v1149_v0, 0 }
  0x6d   :  { %v3944_v24 = vand.u32 4294901760, %v1157_v14 }
  0x6f   :  { %2843 = vmatmul.mubr.f32.gmra.mrb[24].mxu0 %v346_v9  ;;  %2754 = vmatmul.mubr.f32.gmra.mrb[22].mxu1 %v3631_v50 }
  0x70   :  { %2849 = vmatprep.mubr.msk.f32.mxu0 %vm3375_vm0, %v3376_v6  ;;  %2756 = vmatprep.mubr.msk.f32.mxu1 %vm3375_vm0, %v3376_v6 }
  0x73   :  { %2850 = vmatmul.mubr.f32.vlgmr.msra.gmra.mrb[0].mxu0 %v3440_v12  ;;  %2757 = vmatmul.mubr.f32.gmra.mrb[24].mxu1 %v3646_v58 }
  0x74   :  { %2852 = vmatprep.mubr.msk.f32.mxu0 %vm3375_vm0, %v3376_v6  ;;  %3116 = vmatpush3.bf16.msra.mxu0 %v3461_v22 }
  0x77   :  { %2853 = vmatmul.mubr.f32.gmra.mrb[2].mxu0 %v3452_v18 }
  0x78   :  { %2855 = vmatprep.mubr.msk.f32.mxu0 %vm3375_vm0, %v3376_v6 }
  0x7b   :  { %2856 = vmatmul.mubr.f32.gmra.mrb[4].mxu0 %v3454_v19 }
  0x7c   :  { %2858 = vmatprep.mubr.msk.f32.mxu0 %vm3375_vm0, %v3376_v6 }
  0x7f   :  { %2859 = vmatmul.mubr.f32.gmra.mrb[6].mxu0 %v3472_v25 }
  0x80   :  { %2861 = vmatprep.mubr.msk.f32.mxu0 %vm3375_vm0, %v3376_v6 }
  0x83   :  { %2862 = vmatmul.mubr.f32.gmra.mrb[8].mxu0 %v3497_v34 }
  0x84   :  { %2864 = vmatprep.mubr.msk.f32.mxu0 %vm3375_vm0, %v3376_v6 }
  0x87   :  { %2865 = vmatmul.mubr.f32.gmra.mrb[10].mxu0 %v3515_v42 }
  0x88   :  { %2867 = vmatprep.mubr.msk.f32.mxu0 %vm3375_vm0, %v3376_v6 }
  0x8b   :  { %2868 = vmatmul.mubr.f32.gmra.mrb[12].mxu0 %v3541_v53 }
  0x8c   :  { %2870 = vmatprep.mubr.msk.f32.mxu0 %vm3375_vm0, %v3376_v6 }
  0x8f   :  { %2871 = vmatmul.mubr.f32.gmra.mrb[14].mxu0 %v3559_v63 }
  0x90   :  { %2873 = vmatprep.mubr.msk.f32.mxu0 %vm3375_vm0, %v3376_v6 }
  0x93   :  { %2874 = vmatmul.mubr.f32.gmra.mrb[16].mxu0 %v3577_v8 }
  0x94   :  { %2876 = vmatprep.mubr.msk.f32.mxu0 %vm3375_vm0, %v3376_v6 }
  0x97   :  { %2877 = vmatmul.mubr.f32.gmra.mrb[18].mxu0 %v3595_v21 }
  0x98   :  { %2879 = vmatprep.mubr.msk.f32.mxu0 %vm3375_vm0, %v3376_v6 }
  0x99   :  { %v55_v57 = vpop.permute.xlu0 %54  ;;  %v65_v4 = vpop.permute.xlu1 %64 }
  0x9b   :  { %2880 = vmatmul.mubr.f32.gmra.mrb[20].mxu0 %v3613_v37 }
  0x9c   :  { %2882 = vmatprep.mubr.msk.f32.mxu0 %vm3375_vm0, %v3376_v6 }
  0x9d   :  { %v70_v33 = vpop.permute.xlu1 %69 }
  0x9f   :  { %2883 = vmatmul.mubr.f32.gmra.mrb[22].mxu0 %v3631_v50 }
  0xa0   :  { %2885 = vmatprep.mubr.msk.f32.mxu0 %vm3375_vm0, %v3376_v6 }
  0xa3   :  { %2886 = vmatmul.mubr.f32.gmra.mrb[24].mxu0 %v3646_v58 }
  0xa4   :  { %2892 = vmatprep.mubr.msk.f32.mxu0 %vm3375_vm0, %v3376_v6 }
  0xa7   :  { %2893 = vmatmul.mubr.f32.vlgmr.msra.gmra.mrb[0].mxu0 %v3440_v12  ;;  %v1148_v12 = vld [vmem:[%s4159_s3] sm:$0xff] }
  0xa8   :  { %2895 = vmatprep.mubr.msk.f32.mxu0 %vm3375_vm0, %v3376_v6 }
  0xab   :  { %2896 = vmatmul.mubr.f32.gmra.mrb[2].mxu0 %v3452_v18  ;;  %v1154_v18 = vsel %vm1152_vm2, %v1148_v12, 0 }
  0xac   :  { %2898 = vmatprep.mubr.msk.f32.mxu0 %vm3375_vm0, %v3376_v6 }
  0xaf   :  { %2899 = vmatmul.mubr.f32.gmra.mrb[4].mxu0 %v3454_v19  ;;  %v3907_v19 = vand.u32 4294901760, %v1154_v18 }
  0xb0   :  { %2901 = vmatprep.mubr.msk.f32.mxu0 %vm3375_vm0, %v3376_v6 }
  0xb1   :  { %v3910_v22 = vsub.f32 %v1154_v18, %v3907_v19  ;;  %v3951_v18 = vsub.f32 %v1157_v14, %v3944_v24 }
  0xb3   :  { %2902 = vmatmul.mubr.f32.gmra.mrb[6].mxu0 %v3472_v25  ;;  %v1236_v25 = vand.u32 4294901760, %v3910_v22 }
  0xb4   :  { %2904 = vmatprep.mubr.msk.f32.mxu0 %vm3375_vm0, %v3376_v6 }
  0xb7   :  { %2905 = vmatmul.mubr.f32.gmra.mrb[8].mxu0 %v3497_v34 }
  0xb8   :  { %2907 = vmatprep.mubr.msk.f32.mxu0 %vm3375_vm0, %v3376_v6 }
  0xbb   :  { %2908 = vmatmul.mubr.f32.gmra.mrb[10].mxu0 %v3515_v42 }
  0xbc   :  { %2910 = vmatprep.mubr.msk.f32.mxu0 %vm3375_vm0, %v3376_v6 }
  0xbf   :  { %2911 = vmatmul.mubr.f32.gmra.mrb[12].mxu0 %v3541_v53 }
  0xc0   :  { %2913 = vmatprep.mubr.msk.f32.mxu0 %vm3375_vm0, %v3376_v6 }
  0xc1   :  { %v60_v59 = vpop.permute.xlu0 %59 }
  0xc3   :  { %2914 = vmatmul.mubr.f32.gmra.mrb[14].mxu0 %v3559_v63 }
  0xc4   :  { %2916 = vmatprep.mubr.msk.f32.mxu0 %vm3375_vm0, %v3376_v6 }
  0xc7   :  { %2917 = vmatmul.mubr.f32.gmra.mrb[16].mxu0 %v3577_v8 }
  0xc8   :  { %2919 = vmatprep.mubr.msk.f32.mxu0 %vm3375_vm0, %v3376_v6 }
  0xcb   :  { %2920 = vmatmul.mubr.f32.gmra.mrb[18].mxu0 %v3595_v21 }
  0xcc   :  { %2922 = vmatprep.mubr.msk.f32.mxu0 %vm3375_vm0, %v3376_v6 }
  0xcf   :  { %2923 = vmatmul.mubr.f32.gmra.mrb[20].mxu0 %v3613_v37 }
  0xd0   :  { %2925 = vmatprep.mubr.msk.f32.mxu0 %vm3375_vm0, %v3376_v6 }
  0xd3   :  { %2926 = vmatmul.mubr.f32.gmra.mrb[22].mxu0 %v3631_v50 }
  0xd4   :  { %2928 = vmatprep.mubr.msk.f32.mxu0 %vm3375_vm0, %v3376_v6  ;;  %v1237_v6 = vsub.f32 %v3910_v22, %v1236_v25 }
  0xd6   :  { %v1238_v34 = vand.u32 4294901760, %v1237_v6 }
  0xd7   :  { %2929 = vmatmul.mubr.f32.gmra.mrb[24].mxu0 %v3646_v58 }
  0xd8   :  { %2939 = vmatprep.mubr.f32.mxu1 %v1238_v34 }
 0x116   :  { %v431_v42 = vpop.f32.mrb[0].mxu1 }
 0x117   :  { %v2722_v53 = vpop.f32.mrb[1].mxu1  ;;  %v3213_v58 = vadd.f32 %v431_v42, %v55_v57  ;;  %v3953_v42 = vand.u32 4294901760, %v1163_v43 }
 0x118   :  { %v75_v53 = vpop.permute.xlu0 %74 }
 0x11a   :  { %v437_v63 = vpop.f32.mrb[2].mxu1 }
 0x11b   :  { %v2725_v5 = vpop.f32.mrb[3].mxu1  ;;  %v3215_v9 = vadd.f32 %v437_v63, %v60_v59 }
 0x11c   :  { %v85_v57 = vpop.permute.xlu0 %84 }
 0x11e   :  { %v443_v7 = vpop.f32.mrb[4].mxu1 }
 0x11f   :  { %v2728_v8 = vpop.f32.mrb[5].mxu1  ;;  %v3217_v28 = vadd.f32 %v443_v7, %v65_v4 }
 0x120   :  { %v95_v17 = vpop.permute.xlu0 %94 }
 0x122   :  { %v449_v16 = vpop.f32.mrb[6].mxu1 }
 0x123   :  { %v2731_v20 = vpop.f32.mrb[7].mxu1  ;;  %v3219_v6 = vadd.f32 %v449_v16, %v70_v33  ;;  %v1246_v16 = vand.u32 4294901760, %v3951_v18 }
 0x126   :  { %v3916_v21 = vpop.f32.mrb[8].mxu1 }
 0x127   :  { %v2734_v29 = vpop.f32.mrb[9].mxu1 }
 0x12a   :  { %v3918_v30 = vpop.f32.mrb[10].mxu1 }
 0x12b   :  { %v2737_v32 = vpop.f32.mrb[11].mxu1 }
 0x12c   :  { %v3956_v32 = vsub.f32 %v1160_v26, %v3948_v60 }
 0x12e   :  { %v3920_v35 = vpop.f32.mrb[12].mxu1 }
 0x12f   :  { %v2740_v36 = vpop.f32.mrb[13].mxu1 }
 0x132   :  { %v3922_v37 = vpop.f32.mrb[14].mxu1 }
 0x133   :  { %v2743_v38 = vpop.f32.mrb[15].mxu1 }
 0x136   :  { %v3924_v39 = vpop.f32.mrb[16].mxu1 }
 0x137   :  { %v2746_v44 = vpop.f32.mrb[17].mxu1 }
 0x13a   :  { %v3926_v46 = vpop.f32.mrb[18].mxu1 }
 0x13b   :  { %v2749_v47 = vpop.f32.mrb[19].mxu1 }
 0x13c   :  { %v3221_v47 = vadd.f32 %v3916_v21, %v75_v53  ;;  %v1256_v21 = vand.u32 4294901760, %v3956_v32 }
 0x13e   :  { %v3928_v48 = vpop.f32.mrb[20].mxu1 }
 0x13f   :  { %v2752_v50 = vpop.f32.mrb[21].mxu1 }
 0x140   :  { %v80_v50 = vpop.permute.xlu1 %79 }
 0x142   :  { %v3930_v51 = vpop.f32.mrb[22].mxu1 }
 0x143   :  { %v2755_v54 = vpop.f32.mrb[23].mxu1 }
 0x146   :  { %v3932_v55 = vpop.f32.mrb[24].mxu1 }
 0x147   :  { %v2758_v56 = vpop.f32.mrb[25].mxu1 }
 0x148   :  { %v3963_v56 = vsub.f32 %v1163_v43, %v3953_v42  ;;  %v1257_v43 = vsub.f32 %v3956_v32, %v1256_v21 }
 0x17a   :  { %v1056_v61 = vpop.f32.mrb[0].mxu0 }
 0x17b   :  { %v3214_v1 = vadd.f32 %v3213_v58, %v1056_v61  ;;  %v2894_v2 = vpop.f32.mrb[1].mxu0 }
 0x17d   :  { %vm1132_vm3 = vcmp.gt.f32.partialorder %v3214_v1, 0.0  ;;  %v1136_v13 = vmul.f32 0.2, %v3214_v1 }
 0x17e   :  { %v1062_v27 = vpop.f32.mrb[2].mxu0 }
 0x17f   :  { %v1140_v10 = vsel %vm1132_vm3, %v3214_v1, %v1136_v13  ;;  %v3216_v11 = vadd.f32 %v3215_v9, %v1062_v27  ;;  %v2897_v3 = vpop.f32.mrb[3].mxu0 }
 0x180   :  { %v1144_v23 = vmul.f32 %v1140_v10, %v1140_v10  ;;  %v3223_v10 = vadd.f32 %v3918_v30, %v80_v50  ;;  %v1266_v3 = vand.u32 4294901760, %v3963_v56 }
 0x181   :  { %vm1133_vm4 = vcmp.gt.f32.partialorder %v3216_v11, 0.0  ;;  %v1137_v31 = vmul.f32 0.2, %v3216_v11 }
 0x182   :  { %v1166_v40 = vand.u32 4294901760, %v1144_v23  ;;  %v1068_v41 = vpop.f32.mrb[4].mxu0 }
 0x183   :  { %v1141_v45 = vsel %vm1133_vm4, %v3216_v11, %v1137_v31  ;;  %v3218_v49 = vadd.f32 %v3217_v28, %v1068_v41  ;;  %v2900_v52 = vpop.f32.mrb[5].mxu0  ;;  %v1247_v11 = vsub.f32 %v3951_v18, %v1246_v16 }
 0x184   :  { %v1276_v62 = vsub.f32 %v1144_v23, %v1166_v40  ;;  %v1145_v12 = vmul.f32 %v1141_v45, %v1141_v45  ;;  %v3225_v52 = vadd.f32 %v3920_v35, %v85_v57 }
 0x185   :  { %vm1134_vm5 = vcmp.gt.f32.partialorder %v3218_v49, 0.0  ;;  %v1138_v34 = vmul.f32 0.2, %v3218_v49 }
 0x186   :  { %v1169_v63 = vand.u32 4294901760, %v1145_v12  ;;  %v1074_v5 = vpop.f32.mrb[6].mxu0  ;;  %v1277_v7 = vand.u32 4294901760, %v1276_v62 }
 0x187   :  { %v1142_v8 = vsel %vm1134_vm5, %v3218_v49, %v1138_v34  ;;  %v3220_v20 = vadd.f32 %v3219_v6, %v1074_v5  ;;  %v2903_v29 = vpop.f32.mrb[7].mxu0  ;;  %v1267_v34 = vsub.f32 %v3963_v56, %v1266_v3 }
 0x188   :  { %v3958_v36 = vpack.c.bf16 %v1169_v63, %v1166_v40  ;;  %v1283_v38 = vsub.f32 %v1145_v12, %v1169_v63  ;;  %v1146_v44 = vmul.f32 %v1142_v8, %v1142_v8  ;;  %v1278_v61 = vsub.f32 %v1276_v62, %v1277_v7  ;;  %v90_v12 = vpop.permute.xlu1 %89  ;;  %v105_v29 = vpop.permute.xlu0 %104 }
 0x189   :  { %vm1135_vm6 = vcmp.gt.f32.partialorder %v3220_v20, 0.0  ;;  %v1139_v54 = vmul.f32 0.2, %v3220_v20  ;;  %v1268_v50 = vand.u32 4294901760, %v1267_v34 }
 0x18a   :  { %v1172_v58 = vand.u32 4294901760, %v1146_v44  ;;  %v1080_v59 = vpop.f32.mrb[8].mxu0  ;;  %3118 = vmatprep.subr.bf16.mxu1 %v3958_v36  ;;  %v1284_v0 = vand.u32 4294901760, %v1283_v38  ;;  %v3966_v1 = vpack.c.bf16 %v1283_v38, %v1276_v62  ;;  %v1279_v28 = vand.u32 4294901760, %v1278_v61 }
 0x18b   :  { %v1143_v2 = vsel %vm1135_vm6, %v3220_v20, %v1139_v54  ;;  %v3968_v4 = vadd.f32 %v3221_v47, %v1080_v59  ;;  %v2906_v9 = vpop.f32.mrb[9].mxu0  ;;  %3120 = vmatpush3.bf16.msra.mxu1 %v3958_v36  ;;  %v1248_v62 = vand.u32 4294901760, %v1247_v11  ;;  %v1258_v20 = vand.u32 4294901760, %v1257_v43 }
 0x18c   :  { %v1290_v13 = vsub.f32 %v1146_v44, %v1172_v58  ;;  %v1147_v14 = vmul.f32 %v1143_v2, %v1143_v2  ;;  %v1285_v15 = vsub.f32 %v1283_v38, %v1284_v0  ;;  %v3972_v27 = vpack.c.bf16 %v1284_v0, %v1277_v7  ;;  %v100_v2 = vpop.permute.xlu1 %99  ;;  %v3998_v9 = vpop.permute.xlu0 %2439 }
 0x18d   :  { %v3227_v44 = vadd.f32 %v3922_v37, %v90_v12  ;;  %v3229_v0 = vadd.f32 %v3924_v39, %v95_v17 }
 0x18e   :  { %v1175_v23 = vand.u32 4294901760, %v1147_v14  ;;  %v1086_v26 = vpop.f32.mrb[10].mxu0  ;;  %v1286_v31 = vand.u32 4294901760, %v1285_v15  ;;  %v1291_v33 = vand.u32 4294901760, %v1290_v13  ;;  %v3231_v15 = vadd.f32 %v3926_v46, %v100_v2  ;;  %v1792_v2 = vld [vmem:[%s4160_s4 + $0x8] sm:$0xff] }
 0x18f   :  { %v3979_v40 = vadd.f32 %v3223_v10, %v1086_v26  ;;  %v2909_v41 = vpop.f32.mrb[11].mxu0 }
 0x190   :  { %v3984_v30 = vpack.c.bf16 %v1175_v23, %v1172_v58  ;;  %v1297_v45 = vsub.f32 %v1147_v14, %v1175_v23  ;;  %v3125_v49 = vpack.c.bf16 %v1286_v31, %v1279_v28  ;;  %v1292_v53 = vsub.f32 %v1290_v13, %v1291_v33  ;;  %v4010_v17 = vpop.permute.xlu0 %2449  ;;  %v110_v26 = vpop.permute.xlu1 %109 }
 0x191   :  { %v3233_v23 = vadd.f32 %v3928_v48, %v105_v29 }
 0x192   :  { %v1092_v6 = vpop.f32.mrb[12].mxu0  ;;  %3122 = vmatprep.subr.bf16.mxu1 %v3984_v30  ;;  %v1298_v63 = vand.u32 4294901760, %v1297_v45  ;;  %v3137_v5 = vpack.c.bf16 %v1297_v45, %v1290_v13  ;;  %v1293_v54 = vand.u32 4294901760, %v1292_v53 }
 0x193   :  { %v3991_v7 = vadd.f32 %v3225_v52, %v1092_v6  ;;  %v2912_v8 = vpop.f32.mrb[13].mxu0  ;;  %3124 = vmatpush3.bf16.msra.mxu1 %v3984_v30 }
 0x194   :  { %3126 = vmatprep.subr.bf16.mxu1 %v3125_v49  ;;  %v1299_v35 = vsub.f32 %v1297_v45, %v1298_v63  ;;  %v3153_v38 = vpack.c.bf16 %v1298_v63, %v1291_v33  ;;  %v115_v33 = vpop.permute.xlu0 %114 }
 0x195   :  { %v3237_v45 = vadd.f32 %v3932_v55, %v115_v33 }
 0x196   :  { %v1098_v47 = vpop.f32.mrb[14].mxu0  ;;  %2940 = vmatmul.mubr.f32.vlgmr.msra.gmra.mrb[26].mxu1 %v1248_v62  ;;  %v1300_v57 = vand.u32 4294901760, %v1299_v35 }
 0x197   :  { %v3995_v58 = vadd.f32 %v3227_v44, %v1098_v47  ;;  %v2915_v59 = vpop.f32.mrb[15].mxu0  ;;  %3128 = vmatpush3.bf16.msra.mxu1 %v3125_v49  ;;  %2942 = vmatprep.mubr.f32.mxu1 %v1258_v20 }
 0x198   :  { %v3129_v61 = vpack.c.bf16 %v1300_v57, %v1293_v54 }
 0x19a   :  { %v1104_v13 = vpop.f32.mrb[16].mxu0  ;;  %2943 = vmatmul.mubr.f32.gmra.mrb[28].mxu1 %v1268_v50  ;;  %3130 = vmatprep.subr.bf16.mxu1 %v3129_v61 }
 0x19b   :  { %v4000_v37 = vadd.f32 %v3229_v0, %v1104_v13  ;;  %v2918_v14 = vpop.f32.mrb[17].mxu0  ;;  %3132 = vmatpush3.bf16.msra.mxu1 %v3129_v61  ;;  %2953 = vmatprep.mubr.f32.mxu1 %v3907_v19 }
 0x19c   :  { %3134 = vmatprep.subr.bf16.mxu1 %v3966_v1 }
 0x19e   :  { %v1110_v10 = vpop.f32.mrb[18].mxu0  ;;  %2954 = vmatmul.mubr.f32.vlgmr.msra.gmra.mrb[30].mxu1 %v3944_v24 }
 0x19f   :  { %v4006_v39 = vadd.f32 %v3231_v15, %v1110_v10  ;;  %v2921_v11 = vpop.f32.mrb[19].mxu0  ;;  %3136 = vmatpush3.bf16.msra.mxu1 %v3966_v1  ;;  %2956 = vmatprep.mubr.f32.mxu1 %v3948_v60  ;;  %v3235_v1 = vadd.f32 %v3930_v51, %v110_v26  ;;  %v1793_v10 = vld [vmem:[%s4160_s4 + $0x10] sm:$0xff] }
 0x1a0   :  { %3138 = vmatprep.subr.bf16.mxu1 %v3137_v5  ;;  %v1799_v11 = vsel %vm1152_vm2, %v1792_v2, 0 }
 0x1a2   :  { %v1116_v28 = vpop.f32.mrb[20].mxu0  ;;  %2957 = vmatmul.mubr.f32.gmra.mrb[32].mxu1 %v3953_v42 }
 0x1a3   :  { %v4014_v46 = vadd.f32 %v3233_v23, %v1116_v28  ;;  %v2924_v31 = vpop.f32.mrb[21].mxu0  ;;  %3140 = vmatpush3.bf16.msra.mxu1 %v3137_v5  ;;  %2967 = vmatprep.mubr.f32.mxu1 %v3910_v22  ;;  %v1791_v22 = vld [vmem:[%s4160_s4] sm:$0xff] }
 0x1a4   :  { %3142 = vmatprep.subr.bf16.mxu1 %v3958_v36  ;;  %v1802_v31 = vsel %vm1152_vm2, %v1793_v10, 0 }
 0x1a6   :  { %v1122_v41 = vpop.f32.mrb[22].mxu0  ;;  %2968 = vmatmul.mubr.f32.vlgmr.msra.gmra.mrb[34].mxu1 %v3951_v18 }
 0x1a7   :  { %v4020_v43 = vadd.f32 %v3235_v1, %v1122_v41  ;;  %v2927_v48 = vpop.f32.mrb[23].mxu0  ;;  %3144 = vmatpush3.bf16.msra.mxu1 %v3958_v36  ;;  %2970 = vmatprep.mubr.f32.mxu1 %v3956_v32  ;;  %v1794_v1 = vld [vmem:[%s4160_s4 + $0x18] sm:$0xff]  ;;  %v4080_v41 = vand.u32 4294901760, %v1799_v11  ;;  %s3378_s4 = smov [#allocation2]  }
 0x1a8   :  { %3146 = vmatprep.subr.bf16.mxu1 %v3984_v30  ;;  %s2479_s21 = sshll.u32 %s3378_s4, 4  ;;  %s2480_s21 = int_to_ptr.vmem [resolvable:$true] %s2479_s21 }
 0x1a9   :  { %s3350_s22 = scalar_lea.vmem %s2480_s21, 16  ;;  %s3354_s23 = scalar_lea.vmem %s2480_s21, 32 }
 0x1aa   :  { %v1128_v49 = vpop.f32.mrb[24].mxu0  ;;  %2971 = vmatmul.mubr.f32.gmra.mrb[36].mxu1 %v3963_v56  ;;  %p3351_p0 = scmp.ne.s32.totalorder %s2480_s21, %s3350_s22  ;;  %p3355_p1 = scmp.lt.s32.totalorder %s2480_s21, %s2480_s21 }
 0x1ab   :  { %v4027_v52 = vadd.f32 %v3237_v45, %v1128_v49  ;;  %v2930_v51 = vpop.f32.mrb[25].mxu0  ;;  %3148 = vmatpush3.bf16.msra.mxu1 %v3984_v30  ;;  %2981 = vmatprep.mubr.f32.mxu1 %v1236_v25  ;;  %v1796_v25 = vsel %vm1152_vm2, %v1791_v22, 0  ;;  %v4082_v45 = vand.u32 4294901760, %v1802_v31  ;;  %v1805_v49 = vsel %vm1152_vm2, %v1794_v1, 0  ;;  %p3356_p2 = scmp.lt.s32.totalorder %s3354_s23, %s3350_s22 }
 0x1ac   :  { %3150 = vmatprep.subr.bf16.mxu1 %v3972_v27  ;;  %v4056_v55 = vand.u32 4294901760, %v1796_v25 }
 0x1ad   :  { %p3357_p3 = por %p3356_p2, %p3355_p1 }
 0x1ae   :  { %2982 = vmatmul.mubr.f32.vlgmr.msra.gmra.mrb[38].mxu1 %v1246_v16  ;;  %v4059_v18 = vsub.f32 %v1796_v25, %v4056_v55 }
 0x1af   :  { %3152 = vmatpush3.bf16.msra.mxu1 %v3972_v27  ;;  %2984 = vmatprep.mubr.f32.mxu1 %v1256_v21  ;;  %p3358_p4 = pnand %p3357_p3, %p3351_p0 }
 0x1b0   :  { %3154 = vmatprep.subr.bf16.mxu1 %v3153_v38  ;;  %v1878_v32 = vand.u32 4294901760, %v4059_v18 }
 0x1b2   :  { %2985 = vmatmul.mubr.f32.gmra.mrb[40].mxu1 %v1266_v3 }
 0x1b3   :  { %3156 = vmatpush3.bf16.msra.mxu1 %v3153_v38  ;;  %2995 = vmatprep.mubr.f32.mxu1 %v3907_v19 }
 0x1b4   :  { %3158 = vmatprep.subr.bf16.mxu1 %v3958_v36 }
 0x1b6   :  { %2996 = vmatmul.mubr.f32.vlgmr.msra.gmra.mrb[42].mxu1 %v3944_v24 }
 0x1b7   :  { %3160 = vmatpush3.bf16.msra.mxu1 %v3958_v36  ;;  %2998 = vmatprep.mubr.f32.mxu1 %v3948_v60 }
 0x1b8   :  { %3162 = vmatprep.subr.bf16.mxu1 %v3984_v30 }
 0x1ba   :  { %2999 = vmatmul.mubr.f32.gmra.mrb[44].mxu1 %v3953_v42 }
 0x1bb   :  { %3164 = vmatpush3.bf16.msra.mxu1 %v3984_v30  ;;  %3009 = vmatprep.mubr.f32.mxu1 %v3907_v19  ;;  %v1879_v19 = vsub.f32 %v4059_v18, %v1878_v32 }
 0x1be   :  { %3010 = vmatmul.mubr.f32.vlgmr.msra.gmra.mrb[46].mxu1 %v3944_v24  ;;  %v1880_v24 = vand.u32 4294901760, %v1879_v19  ;;  %v4086_v19 = vsub.f32 %v1799_v11, %v4080_v41 }
 0x1bf   :  { %3012 = vmatprep.mubr.f32.mxu1 %v3948_v60 }
 0x1c2   :  { %3013 = vmatmul.mubr.f32.gmra.mrb[48].mxu1 %v3953_v42 }
 0x1c3   :  { %3023 = vmatprep.mubr.f32.mxu1 %v1880_v24 }
 0x269   :  { %v2941_v60 = vpop.f32.mrb[26].mxu1 }
 0x26a   :  { %v1251_v42 = vadd.f32 %v3979_v40, %v2941_v60  ;;  %v1240_v36 = vpop.f32.mrb[27].mxu1  ;;  %v4088_v60 = vand.u32 4294901760, %v1805_v49 }
 0x26b   :  { %v1241_v16 = vadd.f32 %v3968_v4, %v1240_v36 }
 0x26d   :  { %v2944_v56 = vpop.f32.mrb[28].mxu1 }
 0x26e   :  { %v1271_v21 = vadd.f32 %v3995_v58, %v2944_v56  ;;  %v1260_v27 = vpop.f32.mrb[29].mxu1 }
 0x26f   :  { %v1261_v3 = vadd.f32 %v3991_v7, %v1260_v27 }
 0x271   :  { %v2955_v30 = vpop.f32.mrb[30].mxu1 }
 0x272   :  { %v1368_v62 = vadd.f32 %v2955_v30, %v1251_v42  ;;  %v1361_v12 = vpop.f32.mrb[31].mxu1 }
 0x273   :  { %v1362_v6 = vadd.f32 %v1361_v12, %v1241_v16  ;;  %v4091_v16 = vsub.f32 %v1802_v31, %v4082_v45  ;;  %v1888_v12 = vand.u32 4294901760, %v4086_v19 }
 0x275   :  { %v2958_v34 = vpop.f32.mrb[32].mxu1 }
 0x276   :  { %v1380_v53 = vadd.f32 %v2958_v34, %v1271_v21  ;;  %v1373_v63 = vpop.f32.mrb[33].mxu1 }
 0x277   :  { %v1374_v5 = vadd.f32 %v1373_v63, %v1261_v3 }
 0x279   :  { %v2969_v8 = vpop.f32.mrb[34].mxu1 }
 0x27a   :  { %v1467_v20 = vadd.f32 %v2969_v8, %v1368_v62  ;;  %v1459_v40 = vpop.f32.mrb[35].mxu1  ;;  %v1898_v8 = vand.u32 4294901760, %v4091_v16 }
 0x27b   :  { %v1460_v29 = vadd.f32 %v1459_v40, %v1362_v6 }
 0x27d   :  { %v2972_v35 = vpop.f32.mrb[36].mxu1 }
 0x27e   :  { %v1481_v4 = vadd.f32 %v2972_v35, %v1380_v53  ;;  %v1473_v38 = vpop.f32.mrb[37].mxu1  ;;  %v4095_v53 = vsub.f32 %v1805_v49, %v4088_v60 }
 0x27f   :  { %v1474_v44 = vadd.f32 %v1473_v38, %v1374_v5  ;;  %v1889_v38 = vsub.f32 %v4086_v19, %v1888_v12 }
 0x281   :  { %v2983_v47 = vpop.f32.mrb[38].mxu1 }
 0x282   :  { %v1566_v50 = vadd.f32 %v2983_v47, %v1467_v20  ;;  %v1557_v54 = vpop.f32.mrb[39].mxu1 }
 0x283   :  { %v1558_v7 = vadd.f32 %v1557_v54, %v1460_v29  ;;  %v1908_v54 = vand.u32 4294901760, %v4095_v53 }
 0x285   :  { %v2986_v57 = vpop.f32.mrb[40].mxu1 }
 0x286   :  { %v1582_v58 = vadd.f32 %v2986_v57, %v1481_v4  ;;  %v1573_v59 = vpop.f32.mrb[41].mxu1 }
 0x287   :  { %v1574_v61 = vadd.f32 %v1573_v59, %v1474_v44  ;;  %v1899_v59 = vsub.f32 %v4091_v16, %v1898_v8 }
 0x289   :  { %v2997_v0 = vpop.f32.mrb[42].mxu1  ;;  %v1900_v31 = vand.u32 4294901760, %v1899_v59 }
 0x28a   :  { %v1671_v13 = vadd.f32 %v2997_v0, %v1566_v50  ;;  %v1664_v14 = vpop.f32.mrb[43].mxu1 }
 0x28b   :  { %v1665_v15 = vadd.f32 %v1664_v14, %v1558_v7  ;;  %v1890_v14 = vand.u32 4294901760, %v1889_v38 }
 0x28d   :  { %v3000_v23 = vpop.f32.mrb[44].mxu1 }
 0x28e   :  { %v1683_v26 = vadd.f32 %v3000_v23, %v1582_v58  ;;  %v1676_v28 = vpop.f32.mrb[45].mxu1  ;;  %v1909_v23 = vsub.f32 %v4095_v53, %v1908_v54 }
 0x28f   :  { %v1677_v33 = vadd.f32 %v1676_v28, %v1574_v61 }
 0x291   :  { %v3011_v48 = vpop.f32.mrb[46].mxu1 }
 0x292   :  { %v1764_v51 = vadd.f32 %v3011_v48, %v1671_v13  ;;  %v1757_v22 = vpop.f32.mrb[47].mxu1 }
 0x293   :  { %v1758_v25 = vadd.f32 %v1757_v22, %v1665_v15  ;;  %v1910_v22 = vand.u32 4294901760, %v1909_v23 }
 0x294   :  { %vm1780_vm7 = vcmp.gt.f32.partialorder %v1764_v51, 0.0  ;;  %v1784_v24 = vmul.f32 0.2, %v1764_v51 }
 0x295   :  { %vm1779_vm8 = vcmp.gt.f32.partialorder %v1758_v25, 0.0  ;;  %v1783_v42 = vmul.f32 0.2, %v1758_v25  ;;  %v3014_v36 = vpop.f32.mrb[48].mxu1 }
 0x296   :  { %v1788_v56 = vsel %vm1780_vm7, %v1764_v51, %v1784_v24  ;;  %v1776_v21 = vadd.f32 %v3014_v36, %v1683_v26  ;;  %v1769_v27 = vpop.f32.mrb[49].mxu1 }
 0x297   :  { %v1811_v3 = vand.u32 4294901760, %v1788_v56  ;;  %v1787_v30 = vsel %vm1779_vm8, %v1758_v25, %v1783_v42  ;;  %v1770_v62 = vadd.f32 %v1769_v27, %v1677_v33 }
 0x298   :  { %v1808_v6 = vand.u32 4294901760, %v1787_v30  ;;  %vm1782_vm9 = vcmp.gt.f32.partialorder %v1776_v21, 0.0  ;;  %v1786_v34 = vmul.f32 0.2, %v1776_v21 }
 0x299   :  { %v1925_v63 = vsub.f32 %v1788_v56, %v1811_v3  ;;  %vm1781_vm10 = vcmp.gt.f32.partialorder %v1770_v62, 0.0  ;;  %v1785_v5 = vmul.f32 0.2, %v1770_v62 }
 0x29a   :  { %v4098_v20 = vpack.c.bf16 %v1811_v3, %v1808_v6  ;;  %v1918_v40 = vsub.f32 %v1787_v30, %v1808_v6  ;;  %v1790_v29 = vsel %vm1782_vm9, %v1776_v21, %v1786_v34 }
 0x29b   :  { %v1817_v35 = vand.u32 4294901760, %v1790_v29  ;;  %v1789_v4 = vsel %vm1781_vm10, %v1770_v62, %v1785_v5  ;;  %v1926_v44 = vand.u32 4294901760, %v1925_v63 }
 0x29c   :  { %v1814_v47 = vand.u32 4294901760, %v1789_v4  ;;  %3166 = vmatprep.subr.bf16.mxu1 %v4098_v20  ;;  %v1919_v50 = vand.u32 4294901760, %v1918_v40  ;;  %v3181_v7 = vpack.c.bf16 %v1925_v63, %v1918_v40 }
 0x29d   :  { %v1939_v57 = vsub.f32 %v1790_v29, %v1817_v35  ;;  %3168 = vmatpush3.bf16.msra.mxu1 %v4098_v20  ;;  %v1927_v58 = vsub.f32 %v1925_v63, %v1926_v44 }
 0x29e   :  { %v3169_v61 = vpack.c.bf16 %v1817_v35, %v1814_v47  ;;  %v1932_v0 = vsub.f32 %v1789_v4, %v1814_v47  ;;  %v1920_v2 = vsub.f32 %v1918_v40, %v1919_v50  ;;  %v3197_v13 = vpack.c.bf16 %v1926_v44, %v1919_v50 }
 0x29f   :  { %v1928_v15 = vand.u32 4294901760, %v1927_v58  ;;  %v1940_v10 = vand.u32 4294901760, %v1939_v57 }
 0x2a0   :  { %3170 = vmatprep.subr.bf16.mxu1 %v3169_v61  ;;  %v1921_v11 = vand.u32 4294901760, %v1920_v2  ;;  %v1933_v26 = vand.u32 4294901760, %v1932_v0  ;;  %v3185_v28 = vpack.c.bf16 %v1939_v57, %v1932_v0 }
 0x2a1   :  { %3172 = vmatpush3.bf16.msra.mxu1 %v3169_v61  ;;  %v1941_v1 = vsub.f32 %v1939_v57, %v1940_v10 }
 0x2a2   :  { %v3173_v33 = vpack.c.bf16 %v1928_v15, %v1921_v11  ;;  %v1934_v48 = vsub.f32 %v1932_v0, %v1933_v26  ;;  %v3201_v49 = vpack.c.bf16 %v1940_v10, %v1933_v26  ;;  %v2445_v10 = vpop.permute.xlu1 %2444 }
 0x2a3   :  { %v1942_v51 = vand.u32 4294901760, %v1941_v1 }
 0x2a4   :  { %3024 = vmatmul.mubr.f32.vlgmr.msra.gmra.mrb[50].mxu1 %v1890_v14  ;;  %3174 = vmatprep.subr.bf16.mxu1 %v3173_v33  ;;  %v1935_v25 = vand.u32 4294901760, %v1934_v48 }
 0x2a5   :  { %3176 = vmatpush3.bf16.msra.mxu1 %v3173_v33  ;;  %3026 = vmatprep.mubr.f32.mxu1 %v1900_v31 }
 0x2a6   :  { %v3177_v24 = vpack.c.bf16 %v1942_v51, %v1935_v25 }
 0x2a8   :  { %3027 = vmatmul.mubr.f32.gmra.mrb[52].mxu1 %v1910_v22  ;;  %3178 = vmatprep.subr.bf16.mxu1 %v3177_v24 }
 0x2a9   :  { %3180 = vmatpush3.bf16.msra.mxu1 %v3177_v24  ;;  %3037 = vmatprep.mubr.f32.mxu1 %v4056_v55 }
 0x2aa   :  { %3182 = vmatprep.subr.bf16.mxu1 %v3181_v7 }
 0x2ac   :  { %3038 = vmatmul.mubr.f32.vlgmr.msra.gmra.mrb[54].mxu1 %v4080_v41 }
 0x2ad   :  { %3184 = vmatpush3.bf16.msra.mxu1 %v3181_v7  ;;  %3040 = vmatprep.mubr.f32.mxu1 %v4082_v45 }
 0x2ae   :  { %3186 = vmatprep.subr.bf16.mxu1 %v3185_v28 }
 0x2b0   :  { %3041 = vmatmul.mubr.f32.gmra.mrb[56].mxu1 %v4088_v60 }
 0x2b1   :  { %3188 = vmatpush3.bf16.msra.mxu1 %v3185_v28  ;;  %3051 = vmatprep.mubr.f32.mxu1 %v4059_v18 }
 0x2b2   :  { %3190 = vmatprep.subr.bf16.mxu1 %v4098_v20 }
 0x2b4   :  { %3052 = vmatmul.mubr.f32.vlgmr.msra.gmra.mrb[58].mxu1 %v4086_v19 }
 0x2b5   :  { %3192 = vmatpush3.bf16.msra.mxu1 %v4098_v20  ;;  %3054 = vmatprep.mubr.f32.mxu1 %v4091_v16 }
 0x2b6   :  { %3194 = vmatprep.subr.bf16.mxu1 %v3169_v61 }
 0x2b8   :  { %3055 = vmatmul.mubr.f32.gmra.mrb[60].mxu1 %v4095_v53 }
 0x2b9   :  { %3196 = vmatpush3.bf16.msra.mxu1 %v3169_v61  ;;  %3065 = vmatprep.mubr.f32.mxu1 %v1878_v32 }
 0x2ba   :  { %3198 = vmatprep.subr.bf16.mxu1 %v3197_v13 }
 0x2bc   :  { %3066 = vmatmul.mubr.f32.vlgmr.msra.gmra.mrb[62].mxu1 %v1888_v12 }
 0x2bd   :  { %3200 = vmatpush3.bf16.msra.mxu1 %v3197_v13  ;;  %3068 = vmatprep.mubr.f32.mxu1 %v1898_v8 }
 0x2be   :  { %3202 = vmatprep.subr.bf16.mxu1 %v3201_v49 }
 0x2c0   :  { %3069 = vmatmul.mubr.f32.gmra.mrb[64].mxu1 %v1908_v54 }
 0x2c1   :  { %3204 = vmatpush3.bf16.msra.mxu1 %v3201_v49  ;;  %3079 = vmatprep.mubr.f32.mxu1 %v4056_v55 }
 0x2c2   :  { %3206 = vmatprep.subr.bf16.mxu1 %v4098_v20 }
 0x2c4   :  { %3080 = vmatmul.mubr.f32.vlgmr.msra.gmra.mrb[66].mxu1 %v4080_v41 }
 0x2c5   :  { %3208 = vmatpush3.bf16.msra.mxu1 %v4098_v20  ;;  %3082 = vmatprep.mubr.f32.mxu1 %v4082_v45 }
 0x2c6   :  { %3210 = vmatprep.subr.bf16.mxu1 %v3169_v61 }
 0x2c8   :  { %3083 = vmatmul.mubr.f32.gmra.mrb[68].mxu1 %v4088_v60 }
 0x2c9   :  { %3212 = vmatpush3.bf16.msra.mxu1 %v3169_v61  ;;  %3093 = vmatprep.mubr.f32.mxu1 %v4056_v55 }
 0x2cc   :  { %3094 = vmatmul.mubr.f32.vlgmr.msra.gmra.mrb[70].mxu1 %v4080_v41 }
 0x2cd   :  { %3096 = vmatprep.mubr.f32.mxu1 %v4082_v45 }
 0x2d0   :  { %3097 = vmatmul.mubr.f32.gmra.mrb[72].mxu1 %v4088_v60 }
 0x377   :  { %v3025_v18 = vpop.f32.mrb[50].mxu1 }
 0x378   :  { %v1893_v32 = vadd.f32 %v4006_v39, %v3025_v18  ;;  %v1882_v19 = vpop.f32.mrb[51].mxu1  ;;  %v2455_v18 = vpop.permute.xlu1 %2454 }
 0x379   :  { %v1883_v42 = vadd.f32 %v4000_v37, %v1882_v19 }
 0x37b   :  { %v3028_v36 = vpop.f32.mrb[52].mxu1 }
 0x37c   :  { %v1913_v16 = vadd.f32 %v4020_v43, %v3028_v36  ;;  %v1902_v56 = vpop.f32.mrb[53].mxu1 }
 0x37d   :  { %v1903_v21 = vadd.f32 %v4014_v46, %v1902_v56 }
 0x37f   :  { %v3039_v27 = vpop.f32.mrb[54].mxu1 }
 0x380   :  { %v2010_v55 = vadd.f32 %v3039_v27, %v1893_v32  ;;  %v2003_v3 = vpop.f32.mrb[55].mxu1 }
 0x381   :  { %v2004_v41 = vadd.f32 %v2003_v3, %v1883_v42 }
 0x383   :  { %v3042_v30 = vpop.f32.mrb[56].mxu1 }
 0x384   :  { %v2022_v45 = vadd.f32 %v3042_v30, %v1913_v16  ;;  %v2015_v62 = vpop.f32.mrb[57].mxu1 }
 0x385   :  { %v2016_v60 = vadd.f32 %v2015_v62, %v1903_v21 }
 0x387   :  { %v3053_v12 = vpop.f32.mrb[58].mxu1 }
 0x388   :  { %v2109_v6 = vadd.f32 %v3053_v12, %v2010_v55  ;;  %v2101_v39 = vpop.f32.mrb[59].mxu1 }
 0x389   :  { %v2102_v34 = vadd.f32 %v2101_v39, %v2004_v41 }
 0x38b   :  { %v3056_v53 = vpop.f32.mrb[60].mxu1 }
 0x38c   :  { %v2123_v37 = vadd.f32 %v3056_v53, %v2022_v45  ;;  %v2115_v63 = vpop.f32.mrb[61].mxu1 }
 0x38d   :  { %v2116_v5 = vadd.f32 %v2115_v63, %v2016_v60 }
 0x38f   :  { %v3067_v43 = vpop.f32.mrb[62].mxu1 }
 0x390   :  { %v2208_v8 = vadd.f32 %v3067_v43, %v2109_v6  ;;  %v2199_v20 = vpop.f32.mrb[63].mxu1 }
 0x391   :  { %v2200_v46 = vadd.f32 %v2199_v20, %v2102_v34 }
 0x393   :  { %v3070_v40 = vpop.f32.mrb[64].mxu1 }
 0x394   :  { %v2224_v29 = vadd.f32 %v3070_v40, %v2123_v37  ;;  %v2215_v35 = vpop.f32.mrb[65].mxu1 }
 0x395   :  { %v2216_v4 = vadd.f32 %v2215_v35, %v2116_v5 }
 0x397   :  { %v3081_v38 = vpop.f32.mrb[66].mxu1 }
 0x398   :  { %v2313_v44 = vadd.f32 %v3081_v38, %v2208_v8  ;;  %v2306_v47 = vpop.f32.mrb[67].mxu1 }
 0x399   :  { %v2307_v50 = vadd.f32 %v2306_v47, %v2200_v46 }
 0x39b   :  { %v3084_v54 = vpop.f32.mrb[68].mxu1 }
 0x39c   :  { %v2325_v7 = vadd.f32 %v3084_v54, %v2224_v29  ;;  %v2318_v57 = vpop.f32.mrb[69].mxu1 }
 0x39d   :  { %v2319_v58 = vadd.f32 %v2318_v57, %v2216_v4 }
 0x39f   :  { %v3095_v59 = vpop.f32.mrb[70].mxu1 }
 0x3a0   :  { %v2406_v61 = vadd.f32 %v3095_v59, %v2313_v44  ;;  %v2399_v0 = vpop.f32.mrb[71].mxu1 }
 0x3a1   :  { %v2400_v2 = vadd.f32 %v2399_v0, %v2307_v50 }
 0x3a2   :  { %vm2422_vm11 = vcmp.gt.f32.partialorder %v2406_v61, 0.0  ;;  %v2426_v13 = vmul.f32 0.2, %v2406_v61 }
 0x3a3   :  { %vm2421_vm12 = vcmp.gt.f32.partialorder %v2400_v2, 0.0  ;;  %v2425_v14 = vmul.f32 0.2, %v2400_v2  ;;  %v3098_v15 = vpop.f32.mrb[72].mxu1 }
 0x3a4   :  { %v2430_v11 = vsel %vm2422_vm11, %v2406_v61, %v2426_v13  ;;  %v2418_v23 = vadd.f32 %v3098_v15, %v2325_v7  ;;  %v2411_v26 = vpop.f32.mrb[73].mxu1 }
 0x3a5   :  { %v2458_v28 = vmul.f32 %v2445_v10, %v2430_v11  ;;  %v2429_v31 = vsel %vm2421_vm12, %v2400_v2, %v2425_v14  ;;  %v2412_v1 = vadd.f32 %v2411_v26, %v2319_v58 }
 0x3a6   :  { %v2457_v33 = vmul.f32 %v3998_v9, %v2429_v31  ;;  %vm2424_vm13 = vcmp.gt.f32.partialorder %v2418_v23, 0.0  ;;  %v2428_v48 = vmul.f32 0.2, %v2418_v23  ;;  %v2470_v9 = vmul.f32 %v4027_v52, %v4027_v52 }
 0x3a7   :  { %vm2423_vm14 = vcmp.gt.f32.partialorder %v2412_v1, 0.0  ;;  %v2427_v49 = vmul.f32 0.2, %v2412_v1 }
 0x3a8   :  { %v2461_v51 = vadd.f32 %v2458_v28, %v2457_v33  ;;  %v2432_v22 = vsel %vm2424_vm13, %v2418_v23, %v2428_v48 }
 0x3a9   :  { %v2431_v25 = vsel %vm2423_vm14, %v2412_v1, %v2427_v49  ;;  %v2460_v32 = vmul.f32 %v2455_v18, %v2432_v22 }
 0x3aa   :  { %v2459_v24 = vmul.f32 %v4010_v17, %v2431_v25 }
 0x3ac   :  { %v2462_v19 = vadd.f32 %v2461_v51, %v2459_v24 }
 0x3ae   :  { %v2463_v42 = vadd.f32 %v2462_v19, %v2460_v32 }
 0x3b0   :  { %v2464_v36 = vrot.slane %v2463_v42, 4 }
 0x3b2   :  { %v2465_v16 = vadd.f32 %v2464_v36, %v2463_v42 }
 0x3b4   :  { %v2466_v56 = vrot.slane %v2465_v16, 2 }
 0x3b6   :  { %v2467_v21 = vadd.f32 %v2466_v56, %v2465_v16 }
 0x3b8   :  { %v2468_v27 = vrot.slane %v2467_v21, 1 }
 0x3ba   :  { %v2469_v55 = vadd.f32 %v2468_v27, %v2467_v21 }
 0x3bc   :  { %v2471_v3 = vadd.f32 %v2470_v9, %v2469_v55 }
 0x3be   :  { %2472 = vst [vmem:[#allocation2] sm:$0x1] %v2471_v3 }
 0x3bf   :  { %3361 = shalt.err (!%p3358_p4)
}
 0x3c0   :  { %s3362_s1 = scalar_lea.hbm %s4162_s6, 16 }
 0x3c1   :  { %p3363_p5 = scmp.ne.s32.totalorder %s4162_s6, %s3362_s1  ;;  %p3366_p6 = scmp.lt.u32.totalorder %s3362_s1, %s4162_s6 }
 0x3c3   :  { %p3368_p7 = pnand %p3366_p6, %p3363_p5 }
 0x3c5   :  { %3371 = shalt.err (!%p3368_p7)
}
 0x3c6   :  { %2482 = dma.vmem_to_hbm [thread:$0]  %s2480_s21, 16, %s4162_s6, [#allocation3]  }
 0x3c7   :  { %3372 = dma.done.wait [#allocation3], 16  }
 0x3c8   :  { %3373 = vsyncadd [#allocation3], 4294967280 }
 0x3c9   :  { %2486 = vsyncpa [#allocation3], 1 }

</bundles_post_ra>
